<compile_context>
chip_gen: v5e
topology: v5e:2x2
jax: 0.10.0
libtpu: 0.0.40
codegen_flags: <defaults>
</compile_context>

<pallas_src>
import functools

import jax
import jax.numpy as jnp
from jax.experimental import pallas as pl
from jax.experimental.pallas import tpu as pltpu

LANE = 128
SUBLANE = 8

# Below this element count the pallas_call dispatch overhead dominates the
# KB-scale HBM traffic; a fused XLA `where` is strictly cheaper there.
MIN_PALLAS_ELEMENTS = 64 * 1024


def _target_block_rows() -> int:
    """Per-generation cap on sublane-rows per grid step.

    4096 rows (f32): x 2 MiB + bool mask 0.5 MiB + out 2 MiB = 4.5 MiB/buffer,
    9 MiB double-buffered -> fits v5e's 16 MiB default scoped-VMEM limit.
    v7x: HBM ~3.2 TB/s makes the fixed ~0.35 us/step overhead relatively
    costly, so use 8192 rows (18 MiB double-buffered, fits its 32 MiB default).
    """
    try:
        kind = jax.devices()[0].device_kind.lower()
    except Exception:  # defensive: fall back to the everywhere-safe size
        return 4096
    if "v7" in kind:
        return 8192
    return 4096


def _pick_block_rows(rows: int, target: int) -> int:
    """Per-step row count.

    <= 512 rows (~0.25 MiB f32): single full-array block (block dims == array
    dims, so the (8,128) divisibility rule does not apply).
    Larger: aim for ~8 grid steps so input DMA, compute and output writeback
    overlap, and v7x can shard steps across both TensorCores; clamp to
    [512, target] and round to a sublane multiple.
    """
    if rows <= 512:
        return rows
    br = pl.cdiv(rows, 8)
    br = ((br + SUBLANE - 1) // SUBLANE) * SUBLANE
    return max(512, min(br, target))


def _masked_fill_kernel(x_ref, m_ref, o_ref, *, fill_value):
    # Elementwise select over the whole VMEM tile (one VPU vsel per vreg).
    # Mask ref stays bool: 1 B/elem HBM traffic, no wrapper-side convert pass.
    x = x_ref[...]
    fill = jnp.asarray(fill_value, dtype=x.dtype)
    o_ref[...] = jnp.where(m_ref[...], fill, x)


def masked_fill(
    x: jax.Array,
    mask: jax.Array,
    value,
    *,
    min_pallas_elements: int = MIN_PALLAS_ELEMENTS,
    donate_x: bool = False,
) -> jax.Array:
    """masked_fill(x, mask, value) == where(mask, value, x), Pallas-accelerated.

    `value` is assumed to be a static Python scalar (fixed at module __init__,
    as in the PyTorch spec). A traced scalar would instead be plumbed through a
    (1,1) SMEM scalar ref.
    """
    assert x.shape == mask.shape, "mask must have the same shape as x"
    orig_shape = x.shape
    dtype = x.dtype
    fill = jnp.asarray(value, dtype=dtype)

    n = x.size
    # Tiny inputs: fused XLA where beats a custom-call round trip.
    if n == 0 or n < min_pallas_elements:
        return jnp.where(mask, fill, x)

    x_flat = x.reshape(-1)
    m_flat = mask.reshape(-1)

    # Kernel runs on the 128-lane-aligned prefix; the short tail is handled
    # with a plain where (avoids padding/copying the whole flat arrays).
    n_aligned = (n // LANE) * LANE
    rows = n_aligned // LANE
    if rows == 0:
        return jnp.where(mask, fill, x)

    target = _target_block_rows()
    block_rows = _pick_block_rows(rows, target)
    grid = (pl.cdiv(rows, block_rows),)  # partial trailing block masked by Pallas

    x2d = x_flat[:n_aligned].reshape(rows, LANE)
    m2d = m_flat[:n_aligned].reshape(rows, LANE)

    kernel = functools.partial(_masked_fill_kernel, fill_value=value)

    out2d = pl.pallas_call(
        kernel,
        out_shape=jax.ShapeDtypeStruct((rows, LANE), dtype),
        grid_spec=pltpu.PrefetchScalarGridSpec(
            num_scalar_prefetch=0,
            grid=grid,
            in_specs=[
                pl.BlockSpec((block_rows, LANE), lambda i: (i, 0)),
                pl.BlockSpec((block_rows, LANE), lambda i: (i, 0)),
            ],
            out_specs=pl.BlockSpec((block_rows, LANE), lambda i: (i, 0)),
        ),
        compiler_params=pltpu.CompilerParams(
            dimension_semantics=("parallel",),  # shard grid steps across TCs on v7x
        ),
        # When the caller donates x, write the result into x's HBM footprint
        # (saves a full-size output allocation; bytes moved unchanged).
        input_output_aliases=({0: 0} if donate_x else {}),
    )(x2d, m2d)

    out_flat = out2d.reshape(-1)
    if n_aligned < n:
        tail = jnp.where(m_flat[n_aligned:], fill, x_flat[n_aligned:])
        out_flat = jnp.concatenate([out_flat, tail])
    return out_flat.reshape(orig_shape)


if __name__ == "__main__":
    # MaskedFillModel(value=0.5) applied to x of shape (2, 4, 16, 16) + bool mask.
    value = 0.5

    key = jax.random.PRNGKey(0)
    kx, km, kx2, km2 = jax.random.split(key, 4)

    x = jax.random.normal(kx, (2, 4, 16, 16), dtype=jnp.float32)
    mask = jax.random.bernoulli(km, p=0.3, shape=(2, 4, 16, 16))  # bool

    # Force the Pallas path for the small example shape so the kernel runs.
    out = masked_fill(x, mask, value, min_pallas_elements=0)
    out = jax.block_until_ready(out)
    ref = jnp.where(mask, jnp.float32(value), x)
    assert out.shape == x.shape and out.dtype == x.dtype
    assert bool(jnp.array_equal(out, ref))

    # Larger, lane-unaligned input: exercises the multi-step grid and the
    # aligned-prefix + scalar-tail path through the default Pallas route.
    x2 = jax.random.normal(kx2, (1000, 333), dtype=jnp.float32)
    mask2 = jax.random.bernoulli(km2, p=0.5, shape=(1000, 333))  # bool
    out2 = jax.block_until_ready(masked_fill(x2, mask2, value))
    ref2 = jnp.where(mask2, jnp.float32(value), x2)
    assert out2.shape == x2.shape and out2.dtype == x2.dtype
    assert bool(jnp.array_equal(out2, ref2))

    print("KERNEL_OK")
</pallas_src>

<mosaic_0001>
module attributes {stable_mosaic.version = 11 : i64} {
  func.func @_masked_fill_kernel(%arg0: i32, %arg1: memref<16x128xf32, #tpu.memory_space<vmem>>, %arg2: memref<16x128xi32, #tpu.memory_space<vmem>>, %arg3: memref<16x128xf32, #tpu.memory_space<vmem>>) attributes {dimension_semantics = [#tpu.dimension_semantics<parallel>], iteration_bounds = array<i64: 1>, scalar_prefetch = 0 : i64, scratch_operands = 0 : i64, tpu.core_type = #tpu.core_type<tc>, window_params = [{transform_indices = @transform_0, window_bounds = array<i64: 16, 128>}, {transform_indices = @transform_1, window_bounds = array<i64: 16, 128>}, {transform_indices = @transform_2, window_bounds = array<i64: 16, 128>}]} {
    %c0 = arith.constant 0 : index
    %c0_0 = arith.constant 0 : index
    %0 = vector.load %arg1[%c0, %c0_0] : memref<16x128xf32, #tpu.memory_space<vmem>>, vector<16x128xf32>
    %c0_1 = arith.constant 0 : index
    %c0_2 = arith.constant 0 : index
    %1 = vector.load %arg2[%c0_1, %c0_2] : memref<16x128xi32, #tpu.memory_space<vmem>>, vector<16x128xi32>
    %cst = arith.constant dense<0> : vector<16x128xi32>
    %2 = arith.cmpi ne, %1, %cst : vector<16x128xi32>
    %cst_3 = arith.constant 5.000000e-01 : f32
    %3 = vector.broadcast %cst_3 : f32 to vector<16x128xf32>
    %4 = arith.select %2, %3, %0 : vector<16x128xi1>, vector<16x128xf32>
    %c0_4 = arith.constant 0 : index
    %c0_5 = arith.constant 0 : index
    %5 = vector.load %arg3[%c0_4, %c0_5] : memref<16x128xf32, #tpu.memory_space<vmem>>, vector<16x128xf32>
    tpu.vector_store %arg3[%c0_4, %c0_5], %4 {strides = array<i32>} : memref<16x128xf32, #tpu.memory_space<vmem>>, vector<16x128xf32>,
    return
  }
  func.func @transform_0(%arg0: i32) -> (i32, i32) {
    %c0_i32 = arith.constant 0 : i32
    %c0_i32_0 = arith.constant 0 : i32
    return %arg0, %c0_i32 : i32, i32
  }
  func.func @transform_1(%arg0: i32) -> (i32, i32) {
    %c0_i32 = arith.constant 0 : i32
    %c0_i32_0 = arith.constant 0 : i32
    return %arg0, %c0_i32 : i32, i32
  }
  func.func @transform_2(%arg0: i32) -> (i32, i32) {
    %c0_i32 = arith.constant 0 : i32
    %c0_i32_0 = arith.constant 0 : i32
    return %arg0, %c0_i32 : i32, i32
  }
}

</mosaic_0001>

<bundles_post_ra>
// kernel: tpu_custom_call.1
= control target key start
LH: loop header
LB: loop body
LE: loop exit
PB: predicated region body
PF: predicated region fallthrough
CT: control target
= control target key end

     0   :  { %s102_s0 = inlined_call_operand.vmem [shape: f32[16,128], index: 0, kind: input, shape index: {}]   ;;  %s103_s1 = inlined_call_operand.vmem [shape: s32[16,128], index: 1, kind: input, shape index: {}]   ;;  %s104_s2 = inlined_call_operand.hbm [shape: f32[16,128], index: 2, kind: output, shape index: {}]  }
   0x1   :  { %v12_v0 = vld [vmem:[%s102_s0] sm:$0xff]  ;;  %v13_v2 = vld [vmem:[%s102_s0 + $0x8] sm:$0xff]  ;;  %s28_s17 = sshll.u32 %s104_s2, 4  ;;  %s29_s17 = int_to_ptr.hbm [resolvable:$true] %s28_s17 }
   0x2   :  { %v14_v1 = vld [vmem:[%s103_s1] sm:$0xff]  ;;  %v15_v3 = vld [vmem:[%s103_s1 + $0x8] sm:$0xff] }
   0x3   :  { %vm16_vm0 = vcmp.ne.s32.totalorder %v14_v1, 0 }
   0x4   :  { %7 = vsyncpa [#allocation3], 0  ;;  %s69_s20 = smov [#allocation2]   ;;  %v18_v4 = vsel %vm16_vm0, 0.5, %v12_v0  ;;  %vm17_vm1 = vcmp.ne.s32.totalorder %v15_v3, 0  ;;  %s70_s0 = smov 128  }
   0x5   :  { %s26_s21 = sshll.u32 %s69_s20, 4  ;;  %20 = vst [vmem:[#allocation2] sm:$0xff] %v18_v4  ;;  %v19_v5 = vsel %vm17_vm1, 0.5, %v13_v2  ;;  %s71_s22 = smov 8   ;;  %s27_s21 = int_to_ptr.vmem [resolvable:$true] %s26_s21 }
   0x6   :  { %21 = vst [vmem:[#allocation2 + $0x8] sm:$0xff] %v19_v5 }
   0x7   :  { %34 = dma.vmem_to_hbm [thread:$0]  %s27_s21, 256, %s29_s17, [#allocation3], %s70_s0, %s70_s0, %s71_s22  }
   0x8   :  { %67 = dma.done.wait [#allocation3], 256  }
   0x9   :  { %68 = vsyncadd [#allocation3], 4294967040 }
   0xa   :  { %39 = vsyncpa [#allocation3], 1 }

</bundles_post_ra>
